<compile_context>
chip_gen: v7x
topology: tpu7x:2x2x1
jax: 0.10.0
libtpu: 0.0.40
codegen_flags: <defaults>
</compile_context>

<pallas_src>
import functools

import jax
import jax.numpy as jnp
from jax.experimental import pallas as pl
from jax.experimental.pallas import tpu as pltpu

LANE = 128         # lane width: feature dims & reduction tiles padded to this
SUBLANE = 16       # row-tile granularity (safe for bf16 sublane packing)
TM_DESIRED = 256   # target row tile (review: 256-512)
TK_DESIRED = 1024  # target reduction tile (review: 512-1024)


def _round_up(x, m):
    return (x + m - 1) // m * m


def _pad2d(a, rows, cols):
    r, c = a.shape
    return jnp.zeros((rows, cols), a.dtype).at[:r, :c].set(a)


def _vmem_limit_bytes():
    # Generation-aware: v5e/v6e have 128 MiB VMEM, v7x has 64 MiB per TC.
    try:
        cap = pltpu.get_tpu_info().vmem_capacity_bytes
    except Exception:
        cap = 64 * 1024 * 1024
    return int(min(cap * 3 // 4, 96 * 1024 * 1024))


def _pick_tiles(n_pad):
    """Pick (TM, TK): TM multiple of SUBLANE with >=2 row blocks when possible
    (v7x megacore), TK multiple of LANE; both divide n_pad."""
    tk = min(TK_DESIRED, n_pad)
    tk -= tk % LANE
    while n_pad % tk:
        tk -= LANE
    tm = min(TM_DESIRED, n_pad // 2 if n_pad >= 2 * SUBLANE else n_pad)
    tm = max(tm - tm % SUBLANE, SUBLANE)
    while n_pad % tm:
        tm -= SUBLANE
    return tm, tk


# ------------------------------ Pallas kernels ----------------------------- #
def _xw_kernel(x_ref, w_ref, o_ref):
    # feature transform: (TM, Fin) @ (Fin, Fout) on the MXU, f32 accumulate.
    o_ref[...] = jnp.dot(x_ref[...], w_ref[...],
                         preferred_element_type=jnp.float32).astype(o_ref.dtype)


def _agg_fused_kernel(adj_ref, xw_ref, scale_ref, shift_ref, w2_ref, o_ref,
                      acc_ref, *, tk):
    # Layer-1 aggregation with the layer-2 feature transform fused in the
    # epilogue. Â streamed in (TM, TK) blocks; XW1 / W2 are VMEM-resident.
    k = pl.program_id(1)

    @pl.when(k == 0)
    def _():
        acc_ref[...] = jnp.zeros_like(acc_ref)

    start = pl.multiple_of(k * tk, LANE)
    acc_ref[...] += jnp.dot(adj_ref[...], xw_ref[pl.ds(start, tk), :],
                            preferred_element_type=jnp.float32)

    @pl.when(k == pl.num_programs(1) - 1)
    def _():
        # folded conv-bias + inference-BN affine, ReLU, then h @ W2 (dropout
        # p=0.5 is identity in eval mode).
        h = jnp.maximum(acc_ref[...] * scale_ref[...] + shift_ref[...], 0.0)
        o_ref[...] = jnp.dot(h.astype(w2_ref.dtype), w2_ref[...],
                             preferred_element_type=jnp.float32
                             ).astype(o_ref.dtype)


def _agg_final_kernel(adj_ref, xw_ref, shift_ref, o_ref, *, tk):
    # Layer-2 aggregation: out = Â @ XW2 + b2. f32 output accumulated directly
    # in o_ref (its block index is constant along k) — no scratch needed.
    k = pl.program_id(1)

    @pl.when(k == 0)
    def _():
        o_ref[...] = jnp.broadcast_to(shift_ref[...], o_ref.shape)

    start = pl.multiple_of(k * tk, LANE)
    o_ref[...] += jnp.dot(adj_ref[...], xw_ref[pl.ds(start, tk), :],
                          preferred_element_type=jnp.float32)


# ------------------------------ pallas_call wrappers ----------------------- #
def feature_transform(x, w, *, tm, vmem_limit):
    """x: (Npad, Fin) bf16, w: (Fin, Fout) bf16 -> (Npad, Fout) bf16."""
    n_pad, fin = x.shape
    fout = w.shape[1]
    flops = 2 * n_pad * fin * fout
    bytes_accessed = (x.size + w.size + n_pad * fout) * 2
    return pl.pallas_call(
        _xw_kernel,
        out_shape=jax.ShapeDtypeStruct((n_pad, fout), jnp.bfloat16),
        grid_spec=pltpu.PrefetchScalarGridSpec(
            num_scalar_prefetch=0,
            grid=(n_pad // tm,),
            in_specs=[pl.BlockSpec((tm, fin), lambda i: (i, 0)),
                      pl.BlockSpec((fin, fout), lambda i: (0, 0))],
            out_specs=pl.BlockSpec((tm, fout), lambda i: (i, 0)),
        ),
        compiler_params=pltpu.CompilerParams(
            dimension_semantics=("parallel",),
            vmem_limit_bytes=vmem_limit),
        cost_estimate=pl.CostEstimate(flops=flops, transcendentals=0,
                                      bytes_accessed=bytes_accessed),
    )(x, w)


def gcn_aggregate_fused(adj, xw1, scale, shift, w2, *, tm, tk, vmem_limit):
    """XW2 = relu(affine(Â @ XW1)) @ W2 ; Â streamed (tm,tk), XW1/W2 resident."""
    n_pad = adj.shape[0]
    hid = xw1.shape[1]
    out = w2.shape[1]
    kernel = functools.partial(_agg_fused_kernel, tk=tk)
    flops = 2 * n_pad * n_pad * hid + 2 * n_pad * hid * out
    bytes_accessed = (adj.size + xw1.size + w2.size + n_pad * out) * 2 \
        + (scale.size + shift.size) * 4
    return pl.pallas_call(
        kernel,
        out_shape=jax.ShapeDtypeStruct((n_pad, out), jnp.bfloat16),
        grid_spec=pltpu.PrefetchScalarGridSpec(
            num_scalar_prefetch=0,
            grid=(n_pad // tm, n_pad // tk),
            in_specs=[
                pl.BlockSpec((tm, tk), lambda i, k: (i, k)),       # Â tile
                pl.BlockSpec((n_pad, hid), lambda i, k: (0, 0)),   # XW1 resident
                pl.BlockSpec((1, hid), lambda i, k: (0, 0)),       # scale
                pl.BlockSpec((1, hid), lambda i, k: (0, 0)),       # shift
                pl.BlockSpec((hid, out), lambda i, k: (0, 0)),     # W2 resident
            ],
            out_specs=pl.BlockSpec((tm, out), lambda i, k: (i, 0)),
            scratch_shapes=[pltpu.VMEM((tm, hid), jnp.float32)],
        ),
        compiler_params=pltpu.CompilerParams(
            dimension_semantics=("parallel", "arbitrary"),
            vmem_limit_bytes=vmem_limit),
        cost_estimate=pl.CostEstimate(flops=flops, transcendentals=0,
                                      bytes_accessed=bytes_accessed),
    )(adj, xw1, scale, shift, w2)


def gcn_aggregate_final(adj, xw2, shift, *, tm, tk, vmem_limit):
    """out = Â @ XW2 + b2 ; f32 accumulation directly in the output block."""
    n_pad = adj.shape[0]
    out = xw2.shape[1]
    kernel = functools.partial(_agg_final_kernel, tk=tk)
    flops = 2 * n_pad * n_pad * out
    bytes_accessed = (adj.size + xw2.size) * 2 + shift.size * 4 + n_pad * out * 4
    return pl.pallas_call(
        kernel,
        out_shape=jax.ShapeDtypeStruct((n_pad, out), jnp.float32),
        grid_spec=pltpu.PrefetchScalarGridSpec(
            num_scalar_prefetch=0,
            grid=(n_pad // tm, n_pad // tk),
            in_specs=[
                pl.BlockSpec((tm, tk), lambda i, k: (i, k)),       # Â tile
                pl.BlockSpec((n_pad, out), lambda i, k: (0, 0)),   # XW2 resident
                pl.BlockSpec((1, out), lambda i, k: (0, 0)),       # bias
            ],
            out_specs=pl.BlockSpec((tm, out), lambda i, k: (i, 0)),
        ),
        compiler_params=pltpu.CompilerParams(
            dimension_semantics=("parallel", "arbitrary"),
            vmem_limit_bytes=vmem_limit),
        cost_estimate=pl.CostEstimate(flops=flops, transcendentals=0,
                                      bytes_accessed=bytes_accessed),
    )(adj, xw2, shift)


# --------------------------------- JAX glue -------------------------------- #
def gcn_normalized_adj(edges, num_nodes, n_pad=None):
    """Dense PyG-style gcn_norm, built directly at the padded size (f32).
    Â[i, j] carries message j -> i; padded rows/cols stay exactly zero."""
    n_pad = num_nodes if n_pad is None else n_pad
    src, dst = edges[0], edges[1]
    a = jnp.zeros((n_pad, n_pad), jnp.float32)
    a = a.at[dst, src].add(1.0)                       # edge src->dst in row dst
    idx = jnp.arange(num_nodes)
    a = a.at[idx, idx].add(1.0)                       # self loops (real nodes)
    deg = a.sum(axis=1)
    dinv = jnp.where(deg > 0, jax.lax.rsqrt(deg), 0.0)
    return a * dinv[:, None] * dinv[None, :]


def glorot(key, fan_in, fan_out):
    lim = jnp.sqrt(6.0 / (fan_in + fan_out))
    return jax.random.uniform(key, (fan_in, fan_out), jnp.float32, -lim, lim)


def init_params(key, in_channels, hidden_channels, out_channels):
    k1, k2 = jax.random.split(key)
    return {
        "w1": glorot(k1, in_channels, hidden_channels),
        "b1": jnp.zeros((hidden_channels,), jnp.float32),
        "bn_gamma": jnp.ones((hidden_channels,), jnp.float32),
        "bn_beta": jnp.zeros((hidden_channels,), jnp.float32),
        "bn_mean": jnp.zeros((hidden_channels,), jnp.float32),
        "bn_var": jnp.ones((hidden_channels,), jnp.float32),
        "w2": glorot(k2, hidden_channels, out_channels),
        "b2": jnp.zeros((out_channels,), jnp.float32),
    }


def gcn_runner_forward(edges, node_features, params):
    """GCNRunner.forward(edges, node_features) -> (N, out_channels) logits."""
    n, in_c = node_features.shape
    hidden_c = params["w1"].shape[1]
    out_c = params["w2"].shape[1]

    n_pad = _round_up(n, LANE)
    in_p = _round_up(in_c, LANE)
    hid_p = _round_up(hidden_c, LANE)
    out_p = _round_up(out_c, LANE)
    tm, tk = _pick_tiles(n_pad)
    vmem_limit = _vmem_limit_bytes()

    # padded bf16 adjacency (dominant HBM operand; values <= 1, f32 accumulate)
    # TODO(synk): for large sparse graphs replace the dense Â stream with
    # block-CSR + scalar prefetch so all-zero tiles are never DMA'd.
    adj_p = gcn_normalized_adj(edges, n, n_pad).astype(jnp.bfloat16)

    x_p = _pad2d(node_features.astype(jnp.bfloat16), n_pad, in_p)
    w1_p = _pad2d(params["w1"].astype(jnp.bfloat16), in_p, hid_p)
    w2_p = _pad2d(params["w2"].astype(jnp.bfloat16), hid_p, out_p)

    # layer 1: fold GCNConv bias + inference BatchNorm into one affine
    eps = 1e-5
    scale1 = params["bn_gamma"] / jnp.sqrt(params["bn_var"] + eps)
    shift1 = params["bn_beta"] + (params["b1"] - params["bn_mean"]) * scale1
    scale1_p = _pad2d(scale1.reshape(1, -1), 1, hid_p)
    shift1_p = _pad2d(shift1.reshape(1, -1), 1, hid_p)
    b2_p = _pad2d(params["b2"].reshape(1, -1), 1, out_p)

    xw1 = feature_transform(x_p, w1_p, tm=tm, vmem_limit=vmem_limit)
    # TODO(synk): F.dropout(p=0.5) is identity in eval mode; training-mode
    # stochastic masking (pltpu.prng_seed / prng_random_bits) omitted.
    xw2 = gcn_aggregate_fused(adj_p, xw1, scale1_p, shift1_p, w2_p,
                              tm=tm, tk=tk, vmem_limit=vmem_limit)
    out = gcn_aggregate_final(adj_p, xw2, b2_p, tm=tm, tk=tk,
                              vmem_limit=vmem_limit)
    return out[:n, :out_c]


def _reference_forward(edges, node_features, params):
    n = node_features.shape[0]
    adj = gcn_normalized_adj(edges, n)
    eps = 1e-5
    scale1 = params["bn_gamma"] / jnp.sqrt(params["bn_var"] + eps)
    shift1 = params["bn_beta"] - params["bn_mean"] * scale1
    h = adj @ (node_features @ params["w1"]) + params["b1"]
    h = jnp.maximum(h * scale1 + shift1, 0.0)
    return adj @ (h @ params["w2"]) + params["b2"]


# ----------------------------------- main ---------------------------------- #
if __name__ == "__main__":
    N_NODES, IN_C, HIDDEN_C, OUT_C = 16, 8, 32, 16
    N_EDGES = 40

    key = jax.random.PRNGKey(0)
    k_x, k_src, k_dst, k_params = jax.random.split(key, 4)

    node_features = jax.random.normal(k_x, (N_NODES, IN_C), jnp.float32)
    src = jax.random.randint(k_src, (N_EDGES,), 0, N_NODES)
    dst = jax.random.randint(k_dst, (N_EDGES,), 0, N_NODES)
    # undirected edge_index, shape (2, 2*N_EDGES)
    edges = jnp.stack([jnp.concatenate([src, dst]),
                       jnp.concatenate([dst, src])]).astype(jnp.int32)

    params = init_params(k_params, IN_C, HIDDEN_C, OUT_C)

    out = jax.jit(gcn_runner_forward)(edges, node_features, params)
    out = jax.block_until_ready(out)
    assert out.shape == (N_NODES, OUT_C)
    assert bool(jnp.all(jnp.isfinite(out)))

    ref = _reference_forward(edges, node_features, params)
    err = float(jnp.max(jnp.abs(out - ref)))
    assert err < 0.1, f"max abs error vs reference = {err}"

    print("KERNEL_OK")
</pallas_src>

<mosaic_0001>
module attributes {stable_mosaic.version = 11 : i64} {
  func.func private @main(%arg0: i32) attributes {dimension_semantics = [#tpu.dimension_semantics<core_parallel>], iteration_bounds = array<i64: 2>, tpu.core_type = #tpu.core_type<sc_scalar_subcore>, window_params = []} {
    return
  }
}

module attributes {stable_mosaic.version = 11 : i64} {
  func.func private @main(%arg0: i32) attributes {dimension_semantics = [#tpu.dimension_semantics<core_parallel>], iteration_bounds = array<i64: 2>, tpu.core_type = #tpu.core_type<sc_scalar_subcore>, window_params = []} {
    return
  }
}

module attributes {stable_mosaic.version = 11 : i64} {
  func.func @_xw_kernel(%arg0: i32, %arg1: memref<64x128xbf16, #tpu.memory_space<vmem>>, %arg2: memref<128x128xbf16, #tpu.memory_space<vmem>>, %arg3: memref<64x128xbf16, #tpu.memory_space<vmem>>) attributes {dimension_semantics = [#tpu.dimension_semantics<parallel>], iteration_bounds = array<i64: 2>, scalar_prefetch = 0 : i64, scratch_operands = 0 : i64, tpu.core_type = #tpu.core_type<tc>, window_params = [{transform_indices = @transform_0, window_bounds = array<i64: 64, 128>}, {pipeline_mode = #tpu.pipeline_mode<synchronous>, transform_indices = @transform_1, window_bounds = array<i64: 128, 128>}, {transform_indices = @transform_2, window_bounds = array<i64: 64, 128>}]} {
    %c0 = arith.constant 0 : index
    %c0_0 = arith.constant 0 : index
    %0 = vector.load %arg1[%c0, %c0_0] : memref<64x128xbf16, #tpu.memory_space<vmem>>, vector<64x128xbf16>
    %c0_1 = arith.constant 0 : index
    %c0_2 = arith.constant 0 : index
    %1 = vector.load %arg2[%c0_1, %c0_2] : memref<128x128xbf16, #tpu.memory_space<vmem>>, vector<128x128xbf16>
    %cst = arith.constant dense<0.000000e+00> : vector<64x128xf32>
    %2 = tpu.matmul %0, %1, %cst {dimension_numbers = #tpu.dot_dimension_numbers<[1], [0], [0], [1], [0, 0, 1, 1], [], []>} : vector<64x128xbf16>, vector<128x128xbf16>, vector<64x128xf32> -> vector<64x128xf32>
    %3 = arith.truncf %2 : vector<64x128xf32> to vector<64x128xbf16>
    %c0_3 = arith.constant 0 : index
    %c0_4 = arith.constant 0 : index
    %4 = vector.load %arg3[%c0_3, %c0_4] : memref<64x128xbf16, #tpu.memory_space<vmem>>, vector<64x128xbf16>
    tpu.vector_store %arg3[%c0_3, %c0_4], %3 {strides = array<i32>} : memref<64x128xbf16, #tpu.memory_space<vmem>>, vector<64x128xbf16>,
    return
  }
  func.func @transform_0(%arg0: i32) -> (i32, i32) {
    %c0_i32 = arith.constant 0 : i32
    %c0_i32_0 = arith.constant 0 : i32
    return %arg0, %c0_i32 : i32, i32
  }
  func.func @transform_1(%arg0: i32) -> (i32, i32) {
    %c0_i32 = arith.constant 0 : i32
    %c0_i32_0 = arith.constant 0 : i32
    %c0_i32_1 = arith.constant 0 : i32
    return %c0_i32, %c0_i32_0 : i32, i32
  }
  func.func @transform_2(%arg0: i32) -> (i32, i32) {
    %c0_i32 = arith.constant 0 : i32
    %c0_i32_0 = arith.constant 0 : i32
    return %arg0, %c0_i32 : i32, i32
  }
}

module attributes {stable_mosaic.version = 11 : i64} {
  func.func @_agg_fused_kernel(%arg0: i32, %arg1: i32, %arg2: memref<64x128xbf16, #tpu.memory_space<vmem>>, %arg3: memref<128x128xbf16, #tpu.memory_space<vmem>>, %arg4: memref<1x128xf32, #tpu.memory_space<vmem>>, %arg5: memref<1x128xf32, #tpu.memory_space<vmem>>, %arg6: memref<128x128xbf16, #tpu.memory_space<vmem>>, %arg7: memref<64x128xbf16, #tpu.memory_space<vmem>>, %arg8: memref<64x128xf32, #tpu.memory_space<vmem>>) attributes {dimension_semantics = [#tpu.dimension_semantics<parallel>, #tpu.dimension_semantics<arbitrary>], iteration_bounds = array<i64: 2, 1>, scalar_prefetch = 0 : i64, scratch_operands = 1 : i64, tpu.core_type = #tpu.core_type<tc>, window_params = [{transform_indices = @transform_0, window_bounds = array<i64: 64, 128>}, {pipeline_mode = #tpu.pipeline_mode<synchronous>, transform_indices = @transform_1, window_bounds = array<i64: 128, 128>}, {pipeline_mode = #tpu.pipeline_mode<synchronous>, transform_indices = @transform_2, window_bounds = array<i64: 1, 128>}, {pipeline_mode = #tpu.pipeline_mode<synchronous>, transform_indices = @transform_3, window_bounds = array<i64: 1, 128>}, {pipeline_mode = #tpu.pipeline_mode<synchronous>, transform_indices = @transform_4, window_bounds = array<i64: 128, 128>}, {transform_indices = @transform_5, window_bounds = array<i64: 64, 128>}]} {
    %c0_i32 = arith.constant 0 : i32
    %0 = arith.cmpi eq, %arg1, %c0_i32 : i32
    %1 = arith.extui %0 : i1 to i32
    %c0_i32_0 = arith.constant 0 : i32
    %2 = arith.cmpi ne, %1, %c0_i32_0 : i32
    scf.if %2 {
      %cst_9 = arith.constant 0.000000e+00 : f32
      %15 = vector.broadcast %cst_9 : f32 to vector<64x128xf32>
      %c0_10 = arith.constant 0 : index
      %c0_11 = arith.constant 0 : index
      %16 = vector.load %arg8[%c0_10, %c0_11] : memref<64x128xf32, #tpu.memory_space<vmem>>, vector<64x128xf32>
      tpu.vector_store %arg8[%c0_10, %c0_11], %15 {strides = array<i32>} : memref<64x128xf32, #tpu.memory_space<vmem>>, vector<64x128xf32>,
    } else {
    }
    %c128_i32 = arith.constant 128 : i32
    %3 = arith.muli %arg1, %c128_i32 : i32
    %4 = tpu.assume_multiple %3, 128 : i32
    %c0 = arith.constant 0 : index
    %c0_1 = arith.constant 0 : index
    %5 = vector.load %arg8[%c0, %c0_1] : memref<64x128xf32, #tpu.memory_space<vmem>>, vector<64x128xf32>
    %c0_2 = arith.constant 0 : index
    %c0_3 = arith.constant 0 : index
    %6 = vector.load %arg2[%c0_2, %c0_3] : memref<64x128xbf16, #tpu.memory_space<vmem>>, vector<64x128xbf16>
    %7 = arith.index_cast %4 : i32 to index
    %c0_4 = arith.constant 0 : index
    %8 = vector.load %arg3[%7, %c0_4] : memref<128x128xbf16, #tpu.memory_space<vmem>>, vector<128x128xbf16>
    %cst = arith.constant dense<0.000000e+00> : vector<64x128xf32>
    %9 = tpu.matmul %6, %8, %cst {dimension_numbers = #tpu.dot_dimension_numbers<[1], [0], [0], [1], [0, 0, 1, 1], [], []>} : vector<64x128xbf16>, vector<128x128xbf16>, vector<64x128xf32> -> vector<64x128xf32>
    %10 = arith.addf %5, %9 : vector<64x128xf32>
    %c0_5 = arith.constant 0 : index
    %c0_6 = arith.constant 0 : index
    %11 = vector.load %arg8[%c0_5, %c0_6] : memref<64x128xf32, #tpu.memory_space<vmem>>, vector<64x128xf32>
    tpu.vector_store %arg8[%c0_5, %c0_6], %10 {strides = array<i32>} : memref<64x128xf32, #tpu.memory_space<vmem>>, vector<64x128xf32>,
    %c0_i32_7 = arith.constant 0 : i32
    %12 = arith.cmpi eq, %arg1, %c0_i32_7 : i32
    %13 = arith.extui %12 : i1 to i32
    %c0_i32_8 = arith.constant 0 : i32
    %14 = arith.cmpi ne, %13, %c0_i32_8 : i32
    scf.if %14 {
      %c0_9 = arith.constant 0 : index
      %c0_10 = arith.constant 0 : index
      %15 = vector.load %arg8[%c0_9, %c0_10] : memref<64x128xf32, #tpu.memory_space<vmem>>, vector<64x128xf32>
      %c0_11 = arith.constant 0 : index
      %c0_12 = arith.constant 0 : index
      %16 = vector.load %arg4[%c0_11, %c0_12] : memref<1x128xf32, #tpu.memory_space<vmem>>, vector<1x128xf32>
      %17 = vector.broadcast %16 : vector<1x128xf32> to vector<64x128xf32>
      %18 = arith.mulf %15, %17 : vector<64x128xf32>
      %c0_13 = arith.constant 0 : index
      %c0_14 = arith.constant 0 : index
      %19 = vector.load %arg5[%c0_13, %c0_14] : memref<1x128xf32, #tpu.memory_space<vmem>>, vector<1x128xf32>
      %20 = vector.broadcast %19 : vector<1x128xf32> to vector<64x128xf32>
      %21 = arith.addf %18, %20 : vector<64x128xf32>
      %cst_15 = arith.constant 0.000000e+00 : f32
      %22 = vector.broadcast %cst_15 : f32 to vector<64x128xf32>
      %23 = arith.maximumf %21, %22 : vector<64x128xf32>
      %24 = arith.truncf %23 : vector<64x128xf32> to vector<64x128xbf16>
      %c0_16 = arith.constant 0 : index
      %c0_17 = arith.constant 0 : index
      %25 = vector.load %arg6[%c0_16, %c0_17] : memref<128x128xbf16, #tpu.memory_space<vmem>>, vector<128x128xbf16>
      %cst_18 = arith.constant dense<0.000000e+00> : vector<64x128xf32>
      %26 = tpu.matmul %24, %25, %cst_18 {dimension_numbers = #tpu.dot_dimension_numbers<[1], [0], [0], [1], [0, 0, 1, 1], [], []>} : vector<64x128xbf16>, vector<128x128xbf16>, vector<64x128xf32> -> vector<64x128xf32>
      %27 = arith.truncf %26 : vector<64x128xf32> to vector<64x128xbf16>
      %c0_19 = arith.constant 0 : index
      %c0_20 = arith.constant 0 : index
      %28 = vector.load %arg7[%c0_19, %c0_20] : memref<64x128xbf16, #tpu.memory_space<vmem>>, vector<64x128xbf16>
      tpu.vector_store %arg7[%c0_19, %c0_20], %27 {strides = array<i32>} : memref<64x128xbf16, #tpu.memory_space<vmem>>, vector<64x128xbf16>,
    } else {
    }
    return
  }
  func.func @transform_0(%arg0: i32, %arg1: i32) -> (i32, i32) {
    %c0_i32 = arith.constant 0 : i32
    return %arg0, %arg1 : i32, i32
  }
  func.func @transform_1(%arg0: i32, %arg1: i32) -> (i32, i32) {
    %c0_i32 = arith.constant 0 : i32
    %c0_i32_0 = arith.constant 0 : i32
    %c0_i32_1 = arith.constant 0 : i32
    return %c0_i32, %c0_i32_0 : i32, i32
  }
  func.func @transform_2(%arg0: i32, %arg1: i32) -> (i32, i32) {
    %c0_i32 = arith.constant 0 : i32
    %c0_i32_0 = arith.constant 0 : i32
    %c0_i32_1 = arith.constant 0 : i32
    return %c0_i32, %c0_i32_0 : i32, i32
  }
  func.func @transform_3(%arg0: i32, %arg1: i32) -> (i32, i32) {
    %c0_i32 = arith.constant 0 : i32
    %c0_i32_0 = arith.constant 0 : i32
    %c0_i32_1 = arith.constant 0 : i32
    return %c0_i32, %c0_i32_0 : i32, i32
  }
  func.func @transform_4(%arg0: i32, %arg1: i32) -> (i32, i32) {
    %c0_i32 = arith.constant 0 : i32
    %c0_i32_0 = arith.constant 0 : i32
    %c0_i32_1 = arith.constant 0 : i32
    return %c0_i32, %c0_i32_0 : i32, i32
  }
  func.func @transform_5(%arg0: i32, %arg1: i32) -> (i32, i32) {
    %c0_i32 = arith.constant 0 : i32
    %c0_i32_0 = arith.constant 0 : i32
    return %arg0, %c0_i32 : i32, i32
  }
}

module attributes {stable_mosaic.version = 11 : i64} {
  func.func @_agg_final_kernel(%arg0: i32, %arg1: i32, %arg2: memref<64x128xbf16, #tpu.memory_space<vmem>>, %arg3: memref<128x128xbf16, #tpu.memory_space<vmem>>, %arg4: memref<1x128xf32, #tpu.memory_space<vmem>>, %arg5: memref<64x128xf32, #tpu.memory_space<vmem>>) attributes {dimension_semantics = [#tpu.dimension_semantics<parallel>, #tpu.dimension_semantics<arbitrary>], iteration_bounds = array<i64: 2, 1>, scalar_prefetch = 0 : i64, scratch_operands = 0 : i64, tpu.core_type = #tpu.core_type<tc>, window_params = [{transform_indices = @transform_0, window_bounds = array<i64: 64, 128>}, {pipeline_mode = #tpu.pipeline_mode<synchronous>, transform_indices = @transform_1, window_bounds = array<i64: 128, 128>}, {pipeline_mode = #tpu.pipeline_mode<synchronous>, transform_indices = @transform_2, window_bounds = array<i64: 1, 128>}, {transform_indices = @transform_3, window_bounds = array<i64: 64, 128>}]} {
    %c0_i32 = arith.constant 0 : i32
    %0 = arith.cmpi eq, %arg1, %c0_i32 : i32
    %1 = arith.extui %0 : i1 to i32
    %c0_i32_0 = arith.constant 0 : i32
    %2 = arith.cmpi ne, %1, %c0_i32_0 : i32
    scf.if %2 {
      %c0_7 = arith.constant 0 : index
      %c0_8 = arith.constant 0 : index
      %12 = vector.load %arg4[%c0_7, %c0_8] : memref<1x128xf32, #tpu.memory_space<vmem>>, vector<1x128xf32>
      %13 = vector.shape_cast %12 : vector<1x128xf32> to vector<1x128xf32>
      %14 = vector.broadcast %13 : vector<1x128xf32> to vector<64x128xf32>
      %c0_9 = arith.constant 0 : index
      %c0_10 = arith.constant 0 : index
      %15 = vector.load %arg5[%c0_9, %c0_10] : memref<64x128xf32, #tpu.memory_space<vmem>>, vector<64x128xf32>
      tpu.vector_store %arg5[%c0_9, %c0_10], %14 {strides = array<i32>} : memref<64x128xf32, #tpu.memory_space<vmem>>, vector<64x128xf32>,
    } else {
    }
    %c128_i32 = arith.constant 128 : i32
    %3 = arith.muli %arg1, %c128_i32 : i32
    %4 = tpu.assume_multiple %3, 128 : i32
    %c0 = arith.constant 0 : index
    %c0_1 = arith.constant 0 : index
    %5 = vector.load %arg5[%c0, %c0_1] : memref<64x128xf32, #tpu.memory_space<vmem>>, vector<64x128xf32>
    %c0_2 = arith.constant 0 : index
    %c0_3 = arith.constant 0 : index
    %6 = vector.load %arg2[%c0_2, %c0_3] : memref<64x128xbf16, #tpu.memory_space<vmem>>, vector<64x128xbf16>
    %7 = arith.index_cast %4 : i32 to index
    %c0_4 = arith.constant 0 : index
    %8 = vector.load %arg3[%7, %c0_4] : memref<128x128xbf16, #tpu.memory_space<vmem>>, vector<128x128xbf16>
    %cst = arith.constant dense<0.000000e+00> : vector<64x128xf32>
    %9 = tpu.matmul %6, %8, %cst {dimension_numbers = #tpu.dot_dimension_numbers<[1], [0], [0], [1], [0, 0, 1, 1], [], []>} : vector<64x128xbf16>, vector<128x128xbf16>, vector<64x128xf32> -> vector<64x128xf32>
    %10 = arith.addf %5, %9 : vector<64x128xf32>
    %c0_5 = arith.constant 0 : index
    %c0_6 = arith.constant 0 : index
    %11 = vector.load %arg5[%c0_5, %c0_6] : memref<64x128xf32, #tpu.memory_space<vmem>>, vector<64x128xf32>
    tpu.vector_store %arg5[%c0_5, %c0_6], %10 {strides = array<i32>} : memref<64x128xf32, #tpu.memory_space<vmem>>, vector<64x128xf32>,
    return
  }
  func.func @transform_0(%arg0: i32, %arg1: i32) -> (i32, i32) {
    %c0_i32 = arith.constant 0 : i32
    return %arg0, %arg1 : i32, i32
  }
  func.func @transform_1(%arg0: i32, %arg1: i32) -> (i32, i32) {
    %c0_i32 = arith.constant 0 : i32
    %c0_i32_0 = arith.constant 0 : i32
    %c0_i32_1 = arith.constant 0 : i32
    return %c0_i32, %c0_i32_0 : i32, i32
  }
  func.func @transform_2(%arg0: i32, %arg1: i32) -> (i32, i32) {
    %c0_i32 = arith.constant 0 : i32
    %c0_i32_0 = arith.constant 0 : i32
    %c0_i32_1 = arith.constant 0 : i32
    return %c0_i32, %c0_i32_0 : i32, i32
  }
  func.func @transform_3(%arg0: i32, %arg1: i32) -> (i32, i32) {
    %c0_i32 = arith.constant 0 : i32
    %c0_i32_0 = arith.constant 0 : i32
    return %arg0, %c0_i32 : i32, i32
  }
}

</mosaic_0001>

<bundles_post_ra>
// kernel: gcn_runner_forward.3
= control target key start
LH: loop header
LB: loop body
LE: loop exit
PB: predicated region body
PF: predicated region fallthrough
CT: control target
= control target key end

     0   :  { %s562_s9 = smov 0   ;;  %s616_s0 = inlined_call_operand.vmem [shape: bf16[128,128], index: 0, kind: input, shape index: {}]   ;;  %s617_s1 = inlined_call_operand.vmem [shape: bf16[128,128], index: 1, kind: input, shape index: {}]   ;;  %s618_s2 = inlined_call_operand.vmem [shape: bf16[128,128], index: 2, kind: output, shape index: {}]  }
   0x1 LB: > { %s405_s10 = sadd.s32 4294967295, %s545_s9   ;;  %p409_p0 = scmp.ge.s32.totalorder %s545_s9, 1  ;;  %s545_s9 = sphi %s562_s9, %s12_s9  }
   0x2   : > { %p113_p1 = scmp.lt.s32.totalorder %s545_s9, 3 }
   0x4   : > { %p114_p2 = pnand %p409_p0, %p113_p1 }
   0x5   : > { %v527_v0 = vld [vmem:[%s617_s1] sm:$0xff] (!%p114_p2)   ;;  %s410_s13 = sshll.u32 (!%p114_p2), %s405_s10, 3  ;;  %v528_v1 = vld [vmem:[%s617_s1 + $0x8] sm:$0xff] (!%p114_p2)   ;;  %v529_v2 = vld [vmem:[%s617_s1 + $0x10] sm:$0xff] (!%p114_p2)  }
   0x6   : > { %117 = sbr.rel (%p114_p2) target bundleno = 256 (0x100), region = 28  ;;  %p136_p3 = scmp.lt.s32.totalorder (!%p114_p2), %s410_s13, 15  ;;  %479 = vmatprep.subr.bf16.mxu0 (!%p114_p2), %v527_v0  ;;  %503 = vmatprep.subr.bf16.mxu1 (!%p114_p2), %v527_v0  ;;  %v530_v3 = vld [vmem:[%s617_s1 + $0x18] sm:$0xff] (!%p114_p2)   ;;  %v531_v6 = vld [vmem:[%s617_s1 + $0x20] sm:$0xff] (!%p114_p2)   ;;  %v532_v7 = vld [vmem:[%s617_s1 + $0x28] sm:$0xff] (!%p114_p2)  }
   0x7   : > { %480 = vmatpush3.bf16.msra.mxu0 (!%p114_p2), %v527_v0  ;;  %511 = vmatpush3.bf16.msra.mxu1 (!%p114_p2), %v527_v0  ;;  %v533_v8 = vld [vmem:[%s617_s1 + $0x30] sm:$0xff] (!%p114_p2)   ;;  %v534_v9 = vld [vmem:[%s617_s1 + $0x38] sm:$0xff] (!%p114_p2)  }
   0x8   : > { %481 = vmatprep.subr.bf16.mxu0 (!%p114_p2), %v528_v1  ;;  %504 = vmatprep.subr.bf16.mxu1 (!%p114_p2), %v528_v1 }
   0xb   : > { %482 = vmatpush3.bf16.msra.mxu0 (!%p114_p2), %v528_v1  ;;  %512 = vmatpush3.bf16.msra.mxu1 (!%p114_p2), %v528_v1 }
   0xc   : > { %483 = vmatprep.subr.bf16.mxu0 (!%p114_p2), %v529_v2  ;;  %505 = vmatprep.subr.bf16.mxu1 (!%p114_p2), %v529_v2 }
   0xd   : > { %s620_s13 = smov (!%p136_p3, %s410_s13), 15 }
   0xe   : > { %s411_s18 = sshll.u32 %s620_s13, 2 }
   0xf   : > { %s587_s21 = scalar_lea.vmem %s616_s0, %s411_s18  ;;  %484 = vmatpush3.bf16.msra.mxu0 %v529_v2  ;;  %513 = vmatpush3.bf16.msra.mxu1 %v529_v2  ;;  %s145_s6 = scalar_lea.vmem %s618_s2, %s411_s18 }
  0x10   : > { %v535_v4 = vld [vmem:[%s587_s21] sm:$0xff]   ;;  %v536_v5 = vld [vmem:[%s587_s21 + $0x10] sm:$0xff]   ;;  %485 = vmatprep.subr.bf16.mxu0 %v530_v3  ;;  %506 = vmatprep.subr.bf16.mxu1 %v530_v3  ;;  %v537_v10 = vld [vmem:[%s587_s21 + $0x8] sm:$0xff]  }
  0x11   : > { %495 = vmatprep.mubr.bf16.mxu0 %v535_v4  ;;  %499 = vmatprep.mubr.bf16.mxu1 %v536_v5  ;;  %v538_v11 = vld [vmem:[%s587_s21 + $0x18] sm:$0xff]  }
  0x13   : > { %486 = vmatpush3.bf16.msra.mxu0 %v530_v3  ;;  %514 = vmatpush3.bf16.msra.mxu1 %v530_v3 }
  0x14   : > { %487 = vmatprep.subr.bf16.mxu0 %v531_v6  ;;  %507 = vmatprep.subr.bf16.mxu1 %v531_v6 }
  0x17   : > { %488 = vmatpush3.bf16.msra.mxu0 %v531_v6  ;;  %515 = vmatpush3.bf16.msra.mxu1 %v531_v6 }
  0x18   : > { %489 = vmatprep.subr.bf16.mxu0 %v532_v7  ;;  %508 = vmatprep.subr.bf16.mxu1 %v532_v7 }
  0x1b   : > { %490 = vmatpush3.bf16.msra.mxu0 %v532_v7  ;;  %516 = vmatpush3.bf16.msra.mxu1 %v532_v7 }
  0x1c   : > { %491 = vmatprep.subr.bf16.mxu0 %v533_v8  ;;  %509 = vmatprep.subr.bf16.mxu1 %v533_v8 }
  0x1f   : > { %492 = vmatpush3.bf16.msra.mxu0 %v533_v8  ;;  %517 = vmatpush3.bf16.msra.mxu1 %v533_v8 }
  0x20   : > { %493 = vmatprep.subr.bf16.mxu0 %v534_v9  ;;  %510 = vmatprep.subr.bf16.mxu1 %v534_v9 }
  0x23   : > { %494 = vmatpush3.bf16.msra.mxu0 %v534_v9  ;;  %518 = vmatpush3.bf16.msra.mxu1 %v534_v9 }
  0x26   : > { %496 = vmatmul.mubr.bf16.vlgmr.msra.gmra.mrb[0].mxu0 %v537_v10  ;;  %500 = vmatmul.mubr.bf16.vlgmr.msra.gmra.mrb[0].mxu1 %v538_v11 }
  0xf9   : > { %v497_v12 = vpop.f32.mrb[0].mxu0  ;;  %v501_v13 = vpop.f32.mrb[0].mxu1 }
  0xfa   : > { %v278_v14 = vpop.f32.mrb[1].mxu0  ;;  %v294_v15 = vpop.f32.mrb[1].mxu1 }
  0xfb   : > { %v498_v16 = vpop.f32.mrb[2].mxu0  ;;  %v502_v17 = vpop.f32.mrb[2].mxu1 }
  0xfc   : > { %v452_v18 = vpack.c.bf16 %v498_v16, %v497_v12  ;;  %v462_v19 = vpack.c.bf16 %v502_v17, %v501_v13  ;;  %v281_v20 = vpop.f32.mrb[3].mxu0  ;;  %v297_v21 = vpop.f32.mrb[3].mxu1 }
  0xfd   : > { %v447_v22 = vpack.c.bf16 %v281_v20, %v278_v14  ;;  %v457_v23 = vpack.c.bf16 %v297_v21, %v294_v15 }
  0xfe   : > { %464 = vst [vmem:[%s145_s6 + $0x8] sm:$0xff] %v452_v18   ;;  %466 = vst [vmem:[%s145_s6 + $0x18] sm:$0xff] %v462_v19  }
  0xff   : > { %448 = vst [vmem:[%s145_s6] sm:$0xff] %v447_v22   ;;  %465 = vst [vmem:[%s145_s6 + $0x10] sm:$0xff] %v457_v23  }
 0x100 PF: > { %s12_s9 = sadd.s32 1, %s545_s9  }
 0x101   : > { %p9_p4 = scmp.ge.s32.totalorder %s12_s9, 4  }
 0x103   :  { %11 = sbr.rel (!%p9_p4) target bundleno = 1 (0x1), region = 58 }

// kernel: gcn_runner_forward.5
= control target key start
LH: loop header
LB: loop body
LE: loop exit
PB: predicated region body
PF: predicated region fallthrough
CT: control target
= control target key end

     0   :  { %s633_s12 = smov 0   ;;  %s635_s13 = smov 0   ;;  %s703_s0 = inlined_call_operand.vmem [shape: bf16[128,128], index: 0, kind: input, shape index: {}]   ;;  %s704_s1 = inlined_call_operand.vmem [shape: bf16[128,128], index: 1, kind: input, shape index: {}]   ;;  %s705_s2 = inlined_call_operand.vmem [shape: f32[1,128], index: 2, kind: input, shape index: {}]   ;;  %s706_s3 = inlined_call_operand.vmem [shape: f32[128,128], index: 3, kind: output, shape index: {}]  }
   0x1   :  { %s637_s14 = smov 0  }
   0x2 LB: > { %s25_s15 = sadd.s32 1, %s607_s13  ;;  %p481_p0 = scmp.ge.s32.totalorder %s611_s14, 1  ;;  %s611_s14 = sphi %s637_s14, %s13_s14   ;;  %s607_s13 = sphi %s635_s13, %s708_s13   ;;  %s603_s12 = sphi %s633_s12, %s707_s12  }
   0x3   : > { %p27_p1 = scmp.ge.s32.totalorder %s25_s15, 2  ;;  %p155_p2 = scmp.lt.s32.totalorder %s611_s14, 3 }
   0x5   : > { %s710_s15 = smov (%p27_p1, %s25_s15), 0  ;;  %p156_p3 = pnand %p481_p0, %p155_p2 }
   0x6   : > { %v577_v0 = vld [vmem:[%s704_s1] sm:$0xff] (!%p156_p3)   ;;  %s482_s18 = sshll.u32 (!%p156_p3), %s603_s12, 3  ;;  %v578_v1 = vld [vmem:[%s704_s1 + $0x8] sm:$0xff] (!%p156_p3)   ;;  %v579_v2 = vld [vmem:[%s704_s1 + $0x10] sm:$0xff] (!%p156_p3)  }
   0x7   : > { %159 = sbr.rel (%p156_p3) target bundleno = 257 (0x101), region = 32  ;;  %p183_p4 = scmp.lt.s32.totalorder (!%p156_p3), %s482_s18, 15  ;;  %513 = vmatprep.subr.bf16.mxu0 (!%p156_p3), %v577_v0  ;;  %537 = vmatprep.subr.bf16.mxu1 (!%p156_p3), %v577_v0  ;;  %v580_v3 = vld [vmem:[%s704_s1 + $0x18] sm:$0xff] (!%p156_p3)   ;;  %v581_v6 = vld [vmem:[%s704_s1 + $0x20] sm:$0xff] (!%p156_p3)   ;;  %v582_v7 = vld [vmem:[%s704_s1 + $0x28] sm:$0xff] (!%p156_p3)  }
   0x8   : > { %514 = vmatpush3.bf16.msra.mxu0 (!%p156_p3), %v577_v0  ;;  %545 = vmatpush3.bf16.msra.mxu1 (!%p156_p3), %v577_v0  ;;  %v583_v8 = vld [vmem:[%s704_s1 + $0x30] sm:$0xff] (!%p156_p3)   ;;  %v584_v9 = vld [vmem:[%s704_s1 + $0x38] sm:$0xff] (!%p156_p3)   ;;  %v486_v12 = vld [vmem:[%s705_s2] ss:$0 sm:$0xff] (!%p156_p3) }
   0x9   : > { %515 = vmatprep.subr.bf16.mxu0 (!%p156_p3), %v578_v1  ;;  %538 = vmatprep.subr.bf16.mxu1 (!%p156_p3), %v578_v1 }
   0xc   : > { %516 = vmatpush3.bf16.msra.mxu0 (!%p156_p3), %v578_v1  ;;  %546 = vmatpush3.bf16.msra.mxu1 (!%p156_p3), %v578_v1 }
   0xd   : > { %517 = vmatprep.subr.bf16.mxu0 (!%p156_p3), %v579_v2  ;;  %539 = vmatprep.subr.bf16.mxu1 (!%p156_p3), %v579_v2 }
   0xe   : > { %s712_s18 = smov (!%p183_p4, %s482_s18), 15 }
   0xf   : > { %s483_s23 = sshll.u32 %s712_s18, 2  ;;  %s485_s10 = sshll.u32 %s712_s18, 3 }
  0x10   : > { %s666_s26 = scalar_lea.vmem %s703_s0, %s483_s23  ;;  %518 = vmatpush3.bf16.msra.mxu0 %v579_v2  ;;  %547 = vmatpush3.bf16.msra.mxu1 %v579_v2  ;;  %s195_s19 = scalar_lea.vmem %s706_s3, %s485_s10 }
  0x11   : > { %v585_v4 = vld [vmem:[%s666_s26] sm:$0xff]   ;;  %v586_v5 = vld [vmem:[%s666_s26 + $0x10] sm:$0xff]   ;;  %519 = vmatprep.subr.bf16.mxu0 %v580_v3  ;;  %540 = vmatprep.subr.bf16.mxu1 %v580_v3  ;;  %v587_v10 = vld [vmem:[%s666_s26 + $0x8] sm:$0xff]  }
  0x12   : > { %529 = vmatprep.mubr.bf16.mxu0 %v585_v4  ;;  %533 = vmatprep.mubr.bf16.mxu1 %v586_v5  ;;  %v588_v11 = vld [vmem:[%s666_s26 + $0x18] sm:$0xff]  }
  0x14   : > { %520 = vmatpush3.bf16.msra.mxu0 %v580_v3  ;;  %548 = vmatpush3.bf16.msra.mxu1 %v580_v3 }
  0x15   : > { %521 = vmatprep.subr.bf16.mxu0 %v581_v6  ;;  %541 = vmatprep.subr.bf16.mxu1 %v581_v6 }
  0x18   : > { %522 = vmatpush3.bf16.msra.mxu0 %v581_v6  ;;  %549 = vmatpush3.bf16.msra.mxu1 %v581_v6 }
  0x19   : > { %523 = vmatprep.subr.bf16.mxu0 %v582_v7  ;;  %542 = vmatprep.subr.bf16.mxu1 %v582_v7 }
  0x1c   : > { %524 = vmatpush3.bf16.msra.mxu0 %v582_v7  ;;  %550 = vmatpush3.bf16.msra.mxu1 %v582_v7 }
  0x1d   : > { %525 = vmatprep.subr.bf16.mxu0 %v583_v8  ;;  %543 = vmatprep.subr.bf16.mxu1 %v583_v8 }
  0x20   : > { %526 = vmatpush3.bf16.msra.mxu0 %v583_v8  ;;  %551 = vmatpush3.bf16.msra.mxu1 %v583_v8 }
  0x21   : > { %527 = vmatprep.subr.bf16.mxu0 %v584_v9  ;;  %544 = vmatprep.subr.bf16.mxu1 %v584_v9 }
  0x24   : > { %528 = vmatpush3.bf16.msra.mxu0 %v584_v9  ;;  %552 = vmatpush3.bf16.msra.mxu1 %v584_v9 }
  0x27   : > { %530 = vmatmul.mubr.bf16.vlgmr.msra.gmra.mrb[0].mxu0 %v587_v10  ;;  %534 = vmatmul.mubr.bf16.vlgmr.msra.gmra.mrb[0].mxu1 %v588_v11 }
  0xfa   : > { %v531_v13 = vpop.f32.mrb[0].mxu0  ;;  %v535_v14 = vpop.f32.mrb[0].mxu1 }
  0xfb   : > { %v393_v15 = vadd.f32 %v531_v13, %v486_v12  ;;  %v397_v16 = vadd.f32 %v535_v14, %v486_v12  ;;  %v360_v17 = vpop.f32.mrb[1].mxu0  ;;  %v376_v18 = vpop.f32.mrb[1].mxu1 }
  0xfc   : > { %v391_v19 = vadd.f32 %v486_v12, %v360_v17  ;;  %v395_v20 = vadd.f32 %v486_v12, %v376_v18  ;;  %v532_v21 = vpop.f32.mrb[2].mxu0  ;;  %v536_v22 = vpop.f32.mrb[2].mxu1 }
  0xfd   : > { %401 = vst [vmem:[%s195_s19 + $0x10] sm:$0xff] %v393_v15  ;;  %405 = vst [vmem:[%s195_s19 + $0x30] sm:$0xff] %v397_v16  ;;  %v394_v23 = vadd.f32 %v532_v21, %v486_v12  ;;  %v398_v24 = vadd.f32 %v536_v22, %v486_v12  ;;  %v363_v25 = vpop.f32.mrb[3].mxu0  ;;  %v379_v26 = vpop.f32.mrb[3].mxu1 }
  0xfe   : > { %399 = vst [vmem:[%s195_s19] sm:$0xff] %v391_v19  ;;  %403 = vst [vmem:[%s195_s19 + $0x20] sm:$0xff] %v395_v20  ;;  %v392_v27 = vadd.f32 %v486_v12, %v363_v25  ;;  %v396_v28 = vadd.f32 %v486_v12, %v379_v26 }
  0xff   : > { %402 = vst [vmem:[%s195_s19 + $0x18] sm:$0xff] %v394_v23  ;;  %406 = vst [vmem:[%s195_s19 + $0x38] sm:$0xff] %v398_v24 }
 0x100   : > { %400 = vst [vmem:[%s195_s19 + $0x8] sm:$0xff] %v392_v27  ;;  %404 = vst [vmem:[%s195_s19 + $0x28] sm:$0xff] %v396_v28 }
 0x101 PF: > { %s13_s14 = sadd.s32 1, %s611_s14   ;;  %s707_s12 = smov %s607_s13 }
 0x102   : > { %p10_p5 = scmp.ge.s32.totalorder %s13_s14, 4   ;;  %s708_s13 = smov %s710_s15 }
 0x104   :  { %12 = sbr.rel (!%p10_p5) target bundleno = 2 (0x2), region = 67 }

// kernel: gcn_runner_forward.4
= control target key start
LH: loop header
LB: loop body
LE: loop exit
PB: predicated region body
PF: predicated region fallthrough
CT: control target
= control target key end

     0   :  { %s988_s18 = smov 0   ;;  %s990_s19 = smov 0   ;;  %s1088_s0 = inlined_call_operand.vmem [shape: bf16[128,128], index: 0, kind: input, shape index: {}]   ;;  %s1089_s1 = inlined_call_operand.vmem [shape: bf16[128,128], index: 1, kind: input, shape index: {}]   ;;  %s1090_s2 = inlined_call_operand.vmem [shape: f32[1,128], index: 2, kind: input, shape index: {}]   ;;  %s1091_s3 = inlined_call_operand.vmem [shape: f32[1,128], index: 3, kind: input, shape index: {}]   ;;  %s1092_s4 = inlined_call_operand.vmem [shape: bf16[128,128], index: 4, kind: input, shape index: {}]   ;;  %s1093_s5 = inlined_call_operand.vmem [shape: bf16[128,128], index: 5, kind: output, shape index: {}]  }
   0x1   :  { %s992_s20 = smov 0  }
   0x2 LB: > { %s27_s21 = sadd.s32 1, %s952_s19  ;;  %p750_p0 = scmp.ge.s32.totalorder %s956_s20, 1  ;;  %s956_s20 = sphi %s992_s20, %s15_s20   ;;  %s952_s19 = sphi %s990_s19, %s1095_s19   ;;  %s948_s18 = sphi %s988_s18, %s1094_s18  }
   0x3   : > { %p29_p1 = scmp.ge.s32.totalorder %s27_s21, 2  ;;  %p205_p2 = scmp.lt.s32.totalorder %s956_s20, 3 }
   0x5   : > { %s1097_s21 = smov (%p29_p1, %s27_s21), 0  ;;  %p206_p3 = pnand %p750_p0, %p205_p2 }
   0x6   : > { %v914_v0 = vld [vmem:[%s1089_s1] sm:$0xff] (!%p206_p3)   ;;  %s751_s24 = sshll.u32 (!%p206_p3), %s948_s18, 3  ;;  %v915_v1 = vld [vmem:[%s1089_s1 + $0x8] sm:$0xff] (!%p206_p3)   ;;  %v916_v2 = vld [vmem:[%s1089_s1 + $0x10] sm:$0xff] (!%p206_p3)  }
   0x7   : > { %209 = sbr.rel (%p206_p3) target bundleno = 489 (0x1e9), region = 40  ;;  %p237_p4 = scmp.lt.s32.totalorder (!%p206_p3), %s751_s24, 15  ;;  %842 = vmatprep.subr.bf16.mxu0 (!%p206_p3), %v914_v0  ;;  %v917_v3 = vld [vmem:[%s1089_s1 + $0x18] sm:$0xff] (!%p206_p3)   ;;  %v918_v5 = vld [vmem:[%s1089_s1 + $0x20] sm:$0xff] (!%p206_p3)   ;;  %v927_v7 = vld [vmem:[%s1092_s4 + $0x8] sm:$0xff] (!%p206_p3)  }
   0x8   : > { %843 = vmatpush3.bf16.msra.mxu0 (!%p206_p3), %v914_v0  ;;  %v926_v6 = vld [vmem:[%s1092_s4] sm:$0xff] (!%p206_p3)   ;;  %v919_v8 = vld [vmem:[%s1089_s1 + $0x28] sm:$0xff] (!%p206_p3)   ;;  %v928_v9 = vld [vmem:[%s1092_s4 + $0x10] sm:$0xff] (!%p206_p3)  }
   0x9   : > { %844 = vmatprep.subr.bf16.mxu0 (!%p206_p3), %v915_v1  ;;  %866 = vmatprep.subr.bf16.mxu1 (!%p206_p3), %v926_v6  ;;  %v920_v10 = vld [vmem:[%s1089_s1 + $0x30] sm:$0xff] (!%p206_p3)   ;;  %v929_v11 = vld [vmem:[%s1092_s4 + $0x18] sm:$0xff] (!%p206_p3)   ;;  %v930_v13 = vld [vmem:[%s1092_s4 + $0x20] sm:$0xff] (!%p206_p3)  }
   0xa   : > { %867 = vmatpush3.bf16.msra.mxu1 (!%p206_p3), %v926_v6  ;;  %v921_v12 = vld [vmem:[%s1089_s1 + $0x38] sm:$0xff] (!%p206_p3)   ;;  %v931_v17 = vld [vmem:[%s1092_s4 + $0x28] sm:$0xff] (!%p206_p3)   ;;  %v932_v18 = vld [vmem:[%s1092_s4 + $0x30] sm:$0xff] (!%p206_p3)  }
   0xb   : > { %868 = vmatprep.subr.bf16.mxu1 (!%p206_p3), %v927_v7  ;;  %v933_v19 = vld [vmem:[%s1092_s4 + $0x38] sm:$0xff] (!%p206_p3)   ;;  %v767_v20 = vld [vmem:[%s1090_s2] ss:$0 sm:$0xff] (!%p206_p3) }
   0xc   : > { %845 = vmatpush3.bf16.msra.mxu0 (!%p206_p3), %v915_v1  ;;  %v768_v22 = vld [vmem:[%s1091_s3] ss:$0 sm:$0xff] (!%p206_p3) }
   0xd   : > { %846 = vmatprep.subr.bf16.mxu0 (!%p206_p3), %v916_v2 }
   0xe   : > { %s1099_s24 = smov (!%p237_p4, %s751_s24), 15  ;;  %869 = vmatpush3.bf16.msra.mxu1 %v927_v7 }
   0xf   : > { %s752_s29 = sshll.u32 %s1099_s24, 2  ;;  %870 = vmatprep.subr.bf16.mxu1 %v928_v9 }
  0x10   : > { %s1023_s7 = scalar_lea.vmem %s1088_s0, %s752_s29  ;;  %847 = vmatpush3.bf16.msra.mxu0 %v916_v2  ;;  %s249_s23 = scalar_lea.vmem %s1093_s5, %s752_s29 }
  0x11   : > { %v922_v4 = vld [vmem:[%s1023_s7] sm:$0xff]   ;;  %848 = vmatprep.subr.bf16.mxu0 %v917_v3  ;;  %v923_v14 = vld [vmem:[%s1023_s7 + $0x8] sm:$0xff]   ;;  %v924_v15 = vld [vmem:[%s1023_s7 + $0x10] sm:$0xff]  }
  0x12   : > { %858 = vmatprep.mubr.bf16.mxu0 %v922_v4  ;;  %871 = vmatpush3.bf16.msra.mxu1 %v928_v9  ;;  %v925_v16 = vld [vmem:[%s1023_s7 + $0x18] sm:$0xff]  }
  0x13   : > { %872 = vmatprep.subr.bf16.mxu1 %v929_v11 }
  0x14   : > { %849 = vmatpush3.bf16.msra.mxu0 %v917_v3 }
  0x15   : > { %850 = vmatprep.subr.bf16.mxu0 %v918_v5 }
  0x16   : > { %873 = vmatpush3.bf16.msra.mxu1 %v929_v11 }
  0x17   : > { %874 = vmatprep.subr.bf16.mxu1 %v930_v13 }
  0x18   : > { %851 = vmatpush3.bf16.msra.mxu0 %v918_v5 }
  0x19   : > { %852 = vmatprep.subr.bf16.mxu0 %v919_v8 }
  0x1a   : > { %875 = vmatpush3.bf16.msra.mxu1 %v930_v13 }
  0x1b   : > { %876 = vmatprep.subr.bf16.mxu1 %v931_v17 }
  0x1c   : > { %853 = vmatpush3.bf16.msra.mxu0 %v919_v8 }
  0x1d   : > { %854 = vmatprep.subr.bf16.mxu0 %v920_v10 }
  0x1e   : > { %877 = vmatpush3.bf16.msra.mxu1 %v931_v17 }
  0x1f   : > { %878 = vmatprep.subr.bf16.mxu1 %v932_v18 }
  0x20   : > { %855 = vmatpush3.bf16.msra.mxu0 %v920_v10 }
  0x21   : > { %856 = vmatprep.subr.bf16.mxu0 %v921_v12 }
  0x22   : > { %879 = vmatpush3.bf16.msra.mxu1 %v932_v18 }
  0x23   : > { %880 = vmatprep.subr.bf16.mxu1 %v933_v19 }
  0x24   : > { %857 = vmatpush3.bf16.msra.mxu0 %v921_v12 }
  0x26   : > { %881 = vmatpush3.bf16.msra.mxu1 %v933_v19 }
  0x27   : > { %859 = vmatmul.mubr.bf16.vlgmr.msra.gmra.mrb[0].mxu0 %v923_v14 }
  0x28   : > { %862 = vmatprep.mubr.bf16.mxu0 %v924_v15 }
  0x2f   : > { %863 = vmatmul.mubr.bf16.gmra.mrb[4].mxu0 %v925_v16 }
  0xfa   : > { %v860_v21 = vpop.f32.mrb[0].mxu0 }
  0xfb   : > { %v474_v23 = vmul.f32 %v860_v21, %v767_v20  ;;  %v407_v24 = vpop.f32.mrb[1].mxu0 }
  0xfc   : > { %v472_v25 = vmul.f32 %v767_v20, %v407_v24  ;;  %v861_v26 = vpop.f32.mrb[2].mxu0 }
  0xfd   : > { %v489_v27 = vadd.f32 %v768_v22, %v474_v23  ;;  %v475_v28 = vmul.f32 %v861_v26, %v767_v20  ;;  %v410_v29 = vpop.f32.mrb[3].mxu0 }
  0xfe   : > { %v473_v30 = vmul.f32 %v767_v20, %v410_v29  ;;  %v487_v31 = vadd.f32 %v768_v22, %v472_v25 }
  0xff   : > { %v490_v32 = vadd.f32 %v768_v22, %v475_v28  ;;  %v497_v34 = vmax.f32 %v489_v27, 0.0 }
 0x100   : > { %v488_v33 = vadd.f32 %v768_v22, %v473_v30  ;;  %v495_v37 = vmax.f32 %v487_v31, 0.0 }
 0x101   : > { %v498_v35 = vmax.f32 %v490_v32, 0.0 }
 0x102   : > { %v864_v36 = vpop.f32.mrb[4].mxu0  ;;  %v496_v38 = vmax.f32 %v488_v33, 0.0 }
 0x103   : > { %v478_v39 = vmul.f32 %v864_v36, %v767_v20  ;;  %v423_v40 = vpop.f32.mrb[5].mxu0  ;;  %v504_v41 = vpack.c.bf16 %v498_v35, %v497_v34 }
 0x104   : > { %v476_v42 = vmul.f32 %v767_v20, %v423_v40  ;;  %v865_v43 = vpop.f32.mrb[6].mxu0  ;;  %v503_v44 = vpack.c.bf16 %v496_v38, %v495_v37 }
 0x105   : > { %v493_v45 = vadd.f32 %v768_v22, %v478_v39  ;;  %v479_v46 = vmul.f32 %v865_v43, %v767_v20  ;;  %v426_v47 = vpop.f32.mrb[7].mxu0 }
 0x106   : > { %v491_v48 = vadd.f32 %v768_v22, %v476_v42  ;;  %v477_v49 = vmul.f32 %v767_v20, %v426_v47  ;;  %882 = vmatprep.mubr.bf16.mxu1 %v503_v44 }
 0x107   : > { %v494_v50 = vadd.f32 %v768_v22, %v479_v46  ;;  %883 = vmatmul.mubr.bf16.vlgmr.msra.gmra.mrb[0].mxu1 %v504_v41  ;;  %v501_v52 = vmax.f32 %v493_v45, 0.0 }
 0x108   : > { %v492_v51 = vadd.f32 %v768_v22, %v477_v49  ;;  %v499_v54 = vmax.f32 %v491_v48, 0.0 }
 0x109   : > { %v502_v53 = vmax.f32 %v494_v50, 0.0 }
 0x10a   : > { %v500_v55 = vmax.f32 %v492_v51, 0.0 }
 0x10b   : > { %v506_v56 = vpack.c.bf16 %v502_v53, %v501_v52 }
 0x10c   : > { %v505_v57 = vpack.c.bf16 %v500_v55, %v499_v54 }
 0x10e   : > { %886 = vmatprep.mubr.bf16.mxu1 %v505_v57 }
 0x10f   : > { %887 = vmatmul.mubr.bf16.gmra.mrb[4].mxu1 %v506_v56 }
 0x1da   : > { %v884_v58 = vpop.f32.mrb[0].mxu1 }
 0x1db   : > { %v605_v59 = vpop.f32.mrb[1].mxu1 }
 0x1dc   : > { %v885_v60 = vpop.f32.mrb[2].mxu1 }
 0x1dd   : > { %v803_v61 = vpack.c.bf16 %v885_v60, %v884_v58  ;;  %v608_v62 = vpop.f32.mrb[3].mxu1 }
 0x1de   : > { %v798_v63 = vpack.c.bf16 %v608_v62, %v605_v59 }
 0x1df   : > { %815 = vst [vmem:[%s249_s23 + $0x8] sm:$0xff] %v803_v61  }
 0x1e0   : > { %799 = vst [vmem:[%s249_s23] sm:$0xff] %v798_v63  }
 0x1e2   : > { %v888_v0 = vpop.f32.mrb[4].mxu1 }
 0x1e3   : > { %v621_v1 = vpop.f32.mrb[5].mxu1 }
 0x1e4   : > { %v889_v2 = vpop.f32.mrb[6].mxu1 }
 0x1e5   : > { %v813_v3 = vpack.c.bf16 %v889_v2, %v888_v0  ;;  %v624_v4 = vpop.f32.mrb[7].mxu1 }
 0x1e6   : > { %v808_v5 = vpack.c.bf16 %v624_v4, %v621_v1 }
 0x1e7   : > { %817 = vst [vmem:[%s249_s23 + $0x18] sm:$0xff] %v813_v3  }
 0x1e8   : > { %816 = vst [vmem:[%s249_s23 + $0x10] sm:$0xff] %v808_v5  }
 0x1e9 PF: > { %s15_s20 = sadd.s32 1, %s956_s20   ;;  %s1094_s18 = smov %s952_s19 }
 0x1ea   : > { %p12_p5 = scmp.ge.s32.totalorder %s15_s20, 4   ;;  %s1095_s19 = smov %s1097_s21 }
 0x1ec   :  { %14 = sbr.rel (!%p12_p5) target bundleno = 2 (0x2), region = 79 }

</bundles_post_ra>
